<compile_context>
chip_gen: v7x
topology: tpu7x:2x2x1
jax: 0.10.0
libtpu: 0.0.40
codegen_flags: <defaults>
</compile_context>

<pallas_src>
import jax
import jax.numpy as jnp
from jax.experimental import pallas as pl
from jax.experimental.pallas import tpu as pltpu


INPUT_DIM = 448
HIDDEN_DIMS = [256, 128, 64]
OUTPUT_DIM = 2
H3_PAD = 128           # last hidden dim padded 64 -> 128 (lane-dense h3, full-K matmul)
OUT_PAD = 128          # lane-dense padded width of the final layer
BN_EPS = 1e-5
MAX_TB = 2048          # max batch rows per grid step


def _mlp_kernel(x_ref,
                w1_ref, t1_ref,
                w2_ref, t2_ref,
                w3_ref, t3_ref,
                w4_ref, b4_ref,
                o_ref):
    """Fused MLP tile: 3x (bf16 matmul -> f32 shift + ReLU) -> bf16 matmul + bias."""
    # In-kernel cast: x arrives as f32 straight from HBM (no wrapper pre-pass).
    x = x_ref[...].astype(jnp.bfloat16)

    h = jnp.dot(x, w1_ref[...], preferred_element_type=jnp.float32)
    h = jnp.maximum(h + t1_ref[...], 0.0)

    h = jnp.dot(h.astype(jnp.bfloat16), w2_ref[...],
                preferred_element_type=jnp.float32)
    h = jnp.maximum(h + t2_ref[...], 0.0)

    h = jnp.dot(h.astype(jnp.bfloat16), w3_ref[...],
                preferred_element_type=jnp.float32)
    h = jnp.maximum(h + t3_ref[...], 0.0)

    out = jnp.dot(h.astype(jnp.bfloat16), w4_ref[...],
                  preferred_element_type=jnp.float32) + b4_ref[...]
    o_ref[...] = out.astype(o_ref.dtype)


def init_params(key):
    """Deterministic parameter init matching the PyTorch module's shapes."""
    params = {}
    dims = [INPUT_DIM] + HIDDEN_DIMS
    keys = jax.random.split(key, 16)
    ki = 0
    for li, (din, dout) in enumerate(zip(dims[:-1], dims[1:])):
        bound = 1.0 / jnp.sqrt(din)
        params[f"w{li+1}"] = jax.random.uniform(
            keys[ki], (din, dout), jnp.float32, -bound, bound); ki += 1
        params[f"b{li+1}"] = jax.random.uniform(
            keys[ki], (dout,), jnp.float32, -bound, bound); ki += 1
        # BatchNorm1d parameters / running stats (eval mode uses running stats).
        params[f"gamma{li+1}"] = 1.0 + 0.1 * jax.random.normal(keys[ki], (dout,)); ki += 1
        params[f"beta{li+1}"] = 0.1 * jax.random.normal(keys[ki], (dout,)); ki += 1
        params[f"mean{li+1}"] = 0.05 * jax.random.normal(keys[ki - 1], (dout,))
        params[f"var{li+1}"] = jnp.abs(1.0 + 0.1 * jax.random.normal(keys[ki - 1], (dout,)))
    bound = 1.0 / jnp.sqrt(HIDDEN_DIMS[-1])
    params["w4"] = jax.random.uniform(
        keys[ki], (HIDDEN_DIMS[-1], OUTPUT_DIM), jnp.float32, -bound, bound); ki += 1
    params["b4"] = jax.random.uniform(
        keys[ki], (OUTPUT_DIM,), jnp.float32, -bound, bound); ki += 1
    return params


def _round_up(n, m):
    return ((n + m - 1) // m) * m


@jax.jit
def part_moveability_mlp(x, params):
    B = x.shape[0]
    d1, d2 = HIDDEN_DIMS[0], HIDDEN_DIMS[1]

    # Fold Linear bias + eval-mode BatchNorm1d:
    #   BN(xW + b) = (x (W*scale)) + ((b - mean)*scale + beta)
    # Scale goes into the weight columns (one-time op outside the hot loop),
    # shift stays as a per-feature f32 row added on the f32 accumulator.
    ws, ts = [], []
    for li in range(1, 4):
        scale = params[f"gamma{li}"] / jnp.sqrt(params[f"var{li}"] + BN_EPS)
        shift = (params[f"b{li}"] - params[f"mean{li}"]) * scale + params[f"beta{li}"]
        ws.append(params[f"w{li}"] * scale[None, :])
        ts.append(shift.reshape(1, -1))

    # Pad last hidden dim 64 -> 128: padded columns are zero, ReLU keeps them 0,
    # and the padded w4 rows multiply those zeros -> exact same result.
    ws[2] = jnp.pad(ws[2], ((0, 0), (0, H3_PAD - HIDDEN_DIMS[2])))
    ts[2] = jnp.pad(ts[2], ((0, 0), (0, H3_PAD - HIDDEN_DIMS[2])))
    ws = [w.astype(jnp.bfloat16) for w in ws]
    ts = [t.astype(jnp.float32) for t in ts]

    # Lane-dense final layer: zero-pad output columns to 128 and rows to H3_PAD.
    w4 = jnp.zeros((H3_PAD, OUT_PAD), jnp.float32)
    w4 = w4.at[:HIDDEN_DIMS[2], :OUTPUT_DIM].set(params["w4"]).astype(jnp.bfloat16)
    b4 = jnp.zeros((1, OUT_PAD), jnp.float32).at[:, :OUTPUT_DIM].set(params["b4"])

    # Batch tiling: at least 2 grid steps (keeps both v7x TensorCores busy),
    # rows per step a multiple of 8, capped at MAX_TB. No wrapper-side padding —
    # Pallas masks the ragged edge block.
    tb = min(MAX_TB, max(8, _round_up(pl.cdiv(B, 2), 8)))
    grid = (pl.cdiv(B, tb),)

    def const(i):                      # weights/shifts: one block, resident in VMEM
        return (0, 0)

    flops = 2 * B * (INPUT_DIM * d1 + d1 * d2 + d2 * H3_PAD + H3_PAD * OUT_PAD)
    bytes_accessed = (B * INPUT_DIM * 4            # x read (f32)
                      + B * OUT_PAD * 2            # output write (bf16)
                      + sum(int(w.size) * 2 for w in ws)
                      + sum(int(t.size) * 4 for t in ts)
                      + int(w4.size) * 2 + int(b4.size) * 4)

    resident = pl.Buffered(1)          # fetched once; skip double-buffer allocation

    out = pl.pallas_call(
        _mlp_kernel,
        out_shape=jax.ShapeDtypeStruct((B, OUT_PAD), jnp.bfloat16),
        grid=grid,
        in_specs=[
            pl.BlockSpec((tb, INPUT_DIM), lambda i: (i, 0)),
            pl.BlockSpec((INPUT_DIM, d1), const, pipeline_mode=resident),
            pl.BlockSpec((1, d1), const, pipeline_mode=resident),
            pl.BlockSpec((d1, d2), const, pipeline_mode=resident),
            pl.BlockSpec((1, d2), const, pipeline_mode=resident),
            pl.BlockSpec((d2, H3_PAD), const, pipeline_mode=resident),
            pl.BlockSpec((1, H3_PAD), const, pipeline_mode=resident),
            pl.BlockSpec((H3_PAD, OUT_PAD), const, pipeline_mode=resident),
            pl.BlockSpec((1, OUT_PAD), const, pipeline_mode=resident),
        ],
        out_specs=pl.BlockSpec((tb, OUT_PAD), lambda i: (i, 0)),
        compiler_params=pltpu.CompilerParams(
            dimension_semantics=("parallel",),
            vmem_limit_bytes=24 * 1024 * 1024),
        cost_estimate=pl.CostEstimate(
            flops=flops, transcendentals=0, bytes_accessed=bytes_accessed),
    )(x, ws[0], ts[0], ws[1], ts[1], ws[2], ts[2], w4, b4)

    return out[:, :OUTPUT_DIM]


def _reference(x, params):
    """Pure-JAX f32 reference of the eval-mode PyTorch forward."""
    h = x
    for li in range(1, 4):
        h = h @ params[f"w{li}"] + params[f"b{li}"]
        h = (h - params[f"mean{li}"]) / jnp.sqrt(params[f"var{li}"] + BN_EPS)
        h = h * params[f"gamma{li}"] + params[f"beta{li}"]
        h = jnp.maximum(h, 0.0)
        # Dropout(eval) == identity
    return h @ params["w4"] + params["b4"]


if __name__ == "__main__":
    key = jax.random.PRNGKey(0)
    kx, kp = jax.random.split(key)
    params = init_params(kp)

    # Small batch: single grid step.
    B = 8
    x = jax.random.normal(kx, (B, INPUT_DIM), jnp.float32)
    out = jax.block_until_ready(part_moveability_mlp(x, params))
    ref = _reference(x, params)
    assert out.shape == (B, OUTPUT_DIM)
    assert jnp.allclose(out.astype(jnp.float32), ref, atol=5e-2, rtol=5e-2), (
        f"max abs err {jnp.max(jnp.abs(out.astype(jnp.float32) - ref))}")

    # Larger batch: exercises multi-step batch grid + ragged edge block.
    B2 = 200
    x2 = jax.random.normal(jax.random.PRNGKey(1), (B2, INPUT_DIM), jnp.float32)
    out2 = jax.block_until_ready(part_moveability_mlp(x2, params))
    ref2 = _reference(x2, params)
    assert out2.shape == (B2, OUTPUT_DIM)
    assert jnp.allclose(out2.astype(jnp.float32), ref2, atol=5e-2, rtol=5e-2), (
        f"max abs err {jnp.max(jnp.abs(out2.astype(jnp.float32) - ref2))}")

    print("KERNEL_OK")
</pallas_src>

<mosaic_0001>
module attributes {stable_mosaic.version = 11 : i64} {
  func.func @_mlp_kernel(%arg0: i32, %arg1: memref<8x448xf32, #tpu.memory_space<vmem>>, %arg2: memref<448x256xbf16, #tpu.memory_space<vmem>>, %arg3: memref<1x256xf32, #tpu.memory_space<vmem>>, %arg4: memref<256x128xbf16, #tpu.memory_space<vmem>>, %arg5: memref<1x128xf32, #tpu.memory_space<vmem>>, %arg6: memref<128x128xbf16, #tpu.memory_space<vmem>>, %arg7: memref<1x128xf32, #tpu.memory_space<vmem>>, %arg8: memref<128x128xbf16, #tpu.memory_space<vmem>>, %arg9: memref<1x128xf32, #tpu.memory_space<vmem>>, %arg10: memref<8x128xbf16, #tpu.memory_space<vmem>>) attributes {dimension_semantics = [#tpu.dimension_semantics<parallel>], iteration_bounds = array<i64: 1>, scalar_prefetch = 0 : i64, scratch_operands = 0 : i64, tpu.core_type = #tpu.core_type<tc>, window_params = [{transform_indices = @transform_0, window_bounds = array<i64: 8, 448>}, {pipeline_mode = #tpu.pipeline_mode<synchronous>, transform_indices = @transform_1, window_bounds = array<i64: 448, 256>}, {pipeline_mode = #tpu.pipeline_mode<synchronous>, transform_indices = @transform_2, window_bounds = array<i64: 1, 256>}, {pipeline_mode = #tpu.pipeline_mode<synchronous>, transform_indices = @transform_3, window_bounds = array<i64: 256, 128>}, {pipeline_mode = #tpu.pipeline_mode<synchronous>, transform_indices = @transform_4, window_bounds = array<i64: 1, 128>}, {pipeline_mode = #tpu.pipeline_mode<synchronous>, transform_indices = @transform_5, window_bounds = array<i64: 128, 128>}, {pipeline_mode = #tpu.pipeline_mode<synchronous>, transform_indices = @transform_6, window_bounds = array<i64: 1, 128>}, {pipeline_mode = #tpu.pipeline_mode<synchronous>, transform_indices = @transform_7, window_bounds = array<i64: 128, 128>}, {pipeline_mode = #tpu.pipeline_mode<synchronous>, transform_indices = @transform_8, window_bounds = array<i64: 1, 128>}, {transform_indices = @transform_9, window_bounds = array<i64: 8, 128>}]} {
    %c0 = arith.constant 0 : index
    %c0_0 = arith.constant 0 : index
    %0 = vector.load %arg1[%c0, %c0_0] : memref<8x448xf32, #tpu.memory_space<vmem>>, vector<8x448xf32>
    %1 = arith.truncf %0 : vector<8x448xf32> to vector<8x448xbf16>
    %c0_1 = arith.constant 0 : index
    %c0_2 = arith.constant 0 : index
    %2 = vector.load %arg2[%c0_1, %c0_2] : memref<448x256xbf16, #tpu.memory_space<vmem>>, vector<448x256xbf16>
    %cst = arith.constant dense<0.000000e+00> : vector<8x256xf32>
    %3 = tpu.matmul %1, %2, %cst {dimension_numbers = #tpu.dot_dimension_numbers<[1], [0], [0], [1], [0, 0, 1, 1], [], []>} : vector<8x448xbf16>, vector<448x256xbf16>, vector<8x256xf32> -> vector<8x256xf32>
    %c0_3 = arith.constant 0 : index
    %c0_4 = arith.constant 0 : index
    %4 = vector.load %arg3[%c0_3, %c0_4] : memref<1x256xf32, #tpu.memory_space<vmem>>, vector<1x256xf32>
    %5 = vector.broadcast %4 : vector<1x256xf32> to vector<8x256xf32>
    %6 = arith.addf %3, %5 : vector<8x256xf32>
    %cst_5 = arith.constant 0.000000e+00 : f32
    %7 = vector.broadcast %cst_5 : f32 to vector<8x256xf32>
    %8 = arith.maximumf %6, %7 : vector<8x256xf32>
    %9 = arith.truncf %8 : vector<8x256xf32> to vector<8x256xbf16>
    %c0_6 = arith.constant 0 : index
    %c0_7 = arith.constant 0 : index
    %10 = vector.load %arg4[%c0_6, %c0_7] : memref<256x128xbf16, #tpu.memory_space<vmem>>, vector<256x128xbf16>
    %cst_8 = arith.constant dense<0.000000e+00> : vector<8x128xf32>
    %11 = tpu.matmul %9, %10, %cst_8 {dimension_numbers = #tpu.dot_dimension_numbers<[1], [0], [0], [1], [0, 0, 1, 1], [], []>} : vector<8x256xbf16>, vector<256x128xbf16>, vector<8x128xf32> -> vector<8x128xf32>
    %c0_9 = arith.constant 0 : index
    %c0_10 = arith.constant 0 : index
    %12 = vector.load %arg5[%c0_9, %c0_10] : memref<1x128xf32, #tpu.memory_space<vmem>>, vector<1x128xf32>
    %13 = vector.broadcast %12 : vector<1x128xf32> to vector<8x128xf32>
    %14 = arith.addf %11, %13 : vector<8x128xf32>
    %cst_11 = arith.constant 0.000000e+00 : f32
    %15 = vector.broadcast %cst_11 : f32 to vector<8x128xf32>
    %16 = arith.maximumf %14, %15 : vector<8x128xf32>
    %17 = arith.truncf %16 : vector<8x128xf32> to vector<8x128xbf16>
    %c0_12 = arith.constant 0 : index
    %c0_13 = arith.constant 0 : index
    %18 = vector.load %arg6[%c0_12, %c0_13] : memref<128x128xbf16, #tpu.memory_space<vmem>>, vector<128x128xbf16>
    %cst_14 = arith.constant dense<0.000000e+00> : vector<8x128xf32>
    %19 = tpu.matmul %17, %18, %cst_14 {dimension_numbers = #tpu.dot_dimension_numbers<[1], [0], [0], [1], [0, 0, 1, 1], [], []>} : vector<8x128xbf16>, vector<128x128xbf16>, vector<8x128xf32> -> vector<8x128xf32>
    %c0_15 = arith.constant 0 : index
    %c0_16 = arith.constant 0 : index
    %20 = vector.load %arg7[%c0_15, %c0_16] : memref<1x128xf32, #tpu.memory_space<vmem>>, vector<1x128xf32>
    %21 = vector.broadcast %20 : vector<1x128xf32> to vector<8x128xf32>
    %22 = arith.addf %19, %21 : vector<8x128xf32>
    %cst_17 = arith.constant 0.000000e+00 : f32
    %23 = vector.broadcast %cst_17 : f32 to vector<8x128xf32>
    %24 = arith.maximumf %22, %23 : vector<8x128xf32>
    %25 = arith.truncf %24 : vector<8x128xf32> to vector<8x128xbf16>
    %c0_18 = arith.constant 0 : index
    %c0_19 = arith.constant 0 : index
    %26 = vector.load %arg8[%c0_18, %c0_19] : memref<128x128xbf16, #tpu.memory_space<vmem>>, vector<128x128xbf16>
    %cst_20 = arith.constant dense<0.000000e+00> : vector<8x128xf32>
    %27 = tpu.matmul %25, %26, %cst_20 {dimension_numbers = #tpu.dot_dimension_numbers<[1], [0], [0], [1], [0, 0, 1, 1], [], []>} : vector<8x128xbf16>, vector<128x128xbf16>, vector<8x128xf32> -> vector<8x128xf32>
    %c0_21 = arith.constant 0 : index
    %c0_22 = arith.constant 0 : index
    %28 = vector.load %arg9[%c0_21, %c0_22] : memref<1x128xf32, #tpu.memory_space<vmem>>, vector<1x128xf32>
    %29 = vector.broadcast %28 : vector<1x128xf32> to vector<8x128xf32>
    %30 = arith.addf %27, %29 : vector<8x128xf32>
    %31 = arith.truncf %30 : vector<8x128xf32> to vector<8x128xbf16>
    %c0_23 = arith.constant 0 : index
    %c0_24 = arith.constant 0 : index
    %32 = vector.load %arg10[%c0_23, %c0_24] : memref<8x128xbf16, #tpu.memory_space<vmem>>, vector<8x128xbf16>
    tpu.vector_store %arg10[%c0_23, %c0_24], %31 {strides = array<i32>} : memref<8x128xbf16, #tpu.memory_space<vmem>>, vector<8x128xbf16>,
    return
  }
  func.func @transform_0(%arg0: i32) -> (i32, i32) {
    %c0_i32 = arith.constant 0 : i32
    %c0_i32_0 = arith.constant 0 : i32
    return %arg0, %c0_i32 : i32, i32
  }
  func.func @transform_1(%arg0: i32) -> (i32, i32) {
    %c0_i32 = arith.constant 0 : i32
    %c0_i32_0 = arith.constant 0 : i32
    %c0_i32_1 = arith.constant 0 : i32
    return %c0_i32, %c0_i32_0 : i32, i32
  }
  func.func @transform_2(%arg0: i32) -> (i32, i32) {
    %c0_i32 = arith.constant 0 : i32
    %c0_i32_0 = arith.constant 0 : i32
    %c0_i32_1 = arith.constant 0 : i32
    return %c0_i32, %c0_i32_0 : i32, i32
  }
  func.func @transform_3(%arg0: i32) -> (i32, i32) {
    %c0_i32 = arith.constant 0 : i32
    %c0_i32_0 = arith.constant 0 : i32
    %c0_i32_1 = arith.constant 0 : i32
    return %c0_i32, %c0_i32_0 : i32, i32
  }
  func.func @transform_4(%arg0: i32) -> (i32, i32) {
    %c0_i32 = arith.constant 0 : i32
    %c0_i32_0 = arith.constant 0 : i32
    %c0_i32_1 = arith.constant 0 : i32
    return %c0_i32, %c0_i32_0 : i32, i32
  }
  func.func @transform_5(%arg0: i32) -> (i32, i32) {
    %c0_i32 = arith.constant 0 : i32
    %c0_i32_0 = arith.constant 0 : i32
    %c0_i32_1 = arith.constant 0 : i32
    return %c0_i32, %c0_i32_0 : i32, i32
  }
  func.func @transform_6(%arg0: i32) -> (i32, i32) {
    %c0_i32 = arith.constant 0 : i32
    %c0_i32_0 = arith.constant 0 : i32
    %c0_i32_1 = arith.constant 0 : i32
    return %c0_i32, %c0_i32_0 : i32, i32
  }
  func.func @transform_7(%arg0: i32) -> (i32, i32) {
    %c0_i32 = arith.constant 0 : i32
    %c0_i32_0 = arith.constant 0 : i32
    %c0_i32_1 = arith.constant 0 : i32
    return %c0_i32, %c0_i32_0 : i32, i32
  }
  func.func @transform_8(%arg0: i32) -> (i32, i32) {
    %c0_i32 = arith.constant 0 : i32
    %c0_i32_0 = arith.constant 0 : i32
    %c0_i32_1 = arith.constant 0 : i32
    return %c0_i32, %c0_i32_0 : i32, i32
  }
  func.func @transform_9(%arg0: i32) -> (i32, i32) {
    %c0_i32 = arith.constant 0 : i32
    %c0_i32_0 = arith.constant 0 : i32
    return %arg0, %c0_i32 : i32, i32
  }
}

</mosaic_0001>

<bundles_post_ra>
// kernel: part_moveability_mlp.1
= control target key start
LH: loop header
LB: loop body
LE: loop exit
PB: predicated region body
PF: predicated region fallthrough
CT: control target
= control target key end

     0   :  { %vm389_vm0 = vcmask 523264   ;;  %vm1183_vm1 = vmmov 0   ;;  %s1545_s1 = inlined_call_operand.vmem [shape: bf16[448,256], index: 1, kind: input, shape index: {}]   ;;  %s1546_s0 = inlined_call_operand.vmem [shape: f32[8,448], index: 0, kind: input, shape index: {}]   ;;  %s1547_s3 = inlined_call_operand.vmem [shape: bf16[256,128], index: 3, kind: input, shape index: {}]   ;;  %s1548_s5 = inlined_call_operand.vmem [shape: bf16[128,128], index: 5, kind: input, shape index: {}]   ;;  %s1549_s2 = inlined_call_operand.vmem [shape: f32[1,256], index: 2, kind: input, shape index: {}]   ;;  %s1550_s7 = inlined_call_operand.vmem [shape: bf16[128,128], index: 7, kind: input, shape index: {}]   ;;  %s1551_s4 = inlined_call_operand.vmem [shape: f32[1,128], index: 4, kind: input, shape index: {}]   ;;  %s1552_s6 = inlined_call_operand.vmem [shape: f32[1,128], index: 6, kind: input, shape index: {}]   ;;  %s1553_s8 = inlined_call_operand.vmem [shape: f32[1,128], index: 8, kind: input, shape index: {}]   ;;  %s1554_s9 = inlined_call_operand.vmem [shape: bf16[8,128], index: 9, kind: output, shape index: {}]  }
   0x1   :  { %v1066_v0 = vld [vmem:[%s1545_s1 + $0x4] ss:$8 sps:$4 sm:$0xff]   ;;  %v1068_v1 = vld [vmem:[%s1545_s1] ss:$8 sps:$4 sm:$0xff]   ;;  %v1069_v2 = vld [vmem:[%s1545_s1 + $0x14] ss:$8 sps:$4 sm:$0xff]  }
   0x2   :  { %393 = vmatprep.subr.bf16.mxu0 %v1066_v0  ;;  %v1071_v3 = vld [vmem:[%s1545_s1 + $0x10] ss:$8 sps:$4 sm:$0xff]   ;;  %v1072_v4 = vld [vmem:[%s1545_s1 + $0x24] ss:$8 sps:$4 sm:$0xff]   ;;  %v1074_v5 = vld [vmem:[%s1545_s1 + $0x20] ss:$8 sps:$4 sm:$0xff]  }
   0x3   :  { %394 = vmatpush1.bf16.msra.mxu0 %v1068_v1  ;;  %v1075_v6 = vld [vmem:[%s1545_s1 + $0x34] ss:$8 sps:$4 sm:$0xff]   ;;  %v1077_v7 = vld [vmem:[%s1545_s1 + $0x30] ss:$8 sps:$4 sm:$0xff]   ;;  %v1078_v8 = vld [vmem:[%s1545_s1 + $0x44] ss:$8 sps:$4 sm:$0xff]  }
   0x4   :  { %395 = vmatprep.subr.bf16.mxu0 %v1069_v2  ;;  %v1080_v9 = vld [vmem:[%s1545_s1 + $0x40] ss:$8 sps:$4 sm:$0xff]   ;;  %v1081_v10 = vld [vmem:[%s1545_s1 + $0x54] ss:$8 sps:$4 sm:$0xff]   ;;  %v1083_v11 = vld [vmem:[%s1545_s1 + $0x50] ss:$8 sps:$4 sm:$0xff]  }
   0x5   :  { %v1084_v12 = vld [vmem:[%s1545_s1 + $0x64] ss:$8 sps:$4 sm:$0xff]   ;;  %v1086_v15 = vld [vmem:[%s1545_s1 + $0x60] ss:$8 sps:$4 sm:$0xff]   ;;  %v1087_v16 = vld [vmem:[%s1545_s1 + $0x74] ss:$8 sps:$4 sm:$0xff]  }
   0x6   :  { %v34_v13 = vld [vmem:[%s1546_s0 + $0x8] sm:$0xff]  ;;  %v1089_v17 = vld [vmem:[%s1545_s1 + $0x70] ss:$8 sps:$4 sm:$0xff]   ;;  %v1093_v20 = vld [vmem:[%s1545_s1 + $0x94] ss:$8 sps:$4 sm:$0xff]  }
   0x7   :  { %396 = vmatpush1.bf16.msra.mxu0 %v1071_v3  ;;  %v38_v14 = vpack.c.bf16 %v34_v13, %v34_v13  ;;  %v1090_v18 = vld [vmem:[%s1545_s1 + $0x84] ss:$8 sps:$4 sm:$0xff]   ;;  %v1092_v19 = vld [vmem:[%s1545_s1 + $0x80] ss:$8 sps:$4 sm:$0xff]   ;;  %v1095_v21 = vld [vmem:[%s1545_s1 + $0x90] ss:$8 sps:$4 sm:$0xff]  }
   0x8   :  { %397 = vmatprep.subr.bf16.mxu0 %v1072_v4  ;;  %v1096_v22 = vld [vmem:[%s1545_s1 + $0xa4] ss:$8 sps:$4 sm:$0xff]   ;;  %v1098_v23 = vld [vmem:[%s1545_s1 + $0xa0] ss:$8 sps:$4 sm:$0xff]   ;;  %v1099_v24 = vld [vmem:[%s1545_s1 + $0xb4] ss:$8 sps:$4 sm:$0xff]  }
   0x9   :  { %425 = vmatprep.mubr.bf16.mxu0 %v38_v14  ;;  %v1150_v25 = vld [vmem:[%s1547_s3 + $0x40] sm:$0xff]   ;;  %v1101_v27 = vld [vmem:[%s1545_s1 + $0xb0] ss:$8 sps:$4 sm:$0xff]   ;;  %v1152_v28 = vld [vmem:[%s1547_s3 + $0x48] sm:$0xff]  }
   0xa   :  { %v1151_v26 = vld [vmem:[%s1547_s3] sm:$0xff]   ;;  %978 = vmatprep.subr.bf16.mxu1 %v1150_v25  ;;  %v1153_v29 = vld [vmem:[%s1547_s3 + $0x8] sm:$0xff]   ;;  %v1154_v30 = vld [vmem:[%s1547_s3 + $0x50] sm:$0xff]  }
   0xb   :  { %398 = vmatpush1.bf16.msra.mxu0 %v1074_v5  ;;  %979 = vmatpush3.bf16.msra.mxu1 %v1151_v26  ;;  %v1102_v31 = vld [vmem:[%s1545_s1 + $0xc4] ss:$8 sps:$4 sm:$0xff]   ;;  %v1104_v32 = vld [vmem:[%s1545_s1 + $0xc0] ss:$8 sps:$4 sm:$0xff]   ;;  %v1155_v33 = vld [vmem:[%s1547_s3 + $0x10] sm:$0xff]  }
   0xc   :  { %399 = vmatprep.subr.bf16.mxu0 %v1075_v6  ;;  %980 = vmatprep.subr.bf16.mxu1 %v1152_v28  ;;  %v1156_v34 = vld [vmem:[%s1547_s3 + $0x58] sm:$0xff]   ;;  %v1108_v37 = vld [vmem:[%s1545_s1 + $0xe4] ss:$8 sps:$4 sm:$0xff]   ;;  %v1110_v41 = vld [vmem:[%s1545_s1 + $0xe0] ss:$8 sps:$4 sm:$0xff]  }
   0xd   :  { %v1105_v35 = vld [vmem:[%s1545_s1 + $0xd4] ss:$8 sps:$4 sm:$0xff]   ;;  %v1107_v36 = vld [vmem:[%s1545_s1 + $0xd0] ss:$8 sps:$4 sm:$0xff]   ;;  %v1158_v39 = vld [vmem:[%s1547_s3 + $0x60] sm:$0xff]  }
   0xe   :  { %v1157_v38 = vld [vmem:[%s1547_s3 + $0x18] sm:$0xff]   ;;  %v1159_v40 = vld [vmem:[%s1547_s3 + $0x20] sm:$0xff]   ;;  %v1160_v42 = vld [vmem:[%s1547_s3 + $0x68] sm:$0xff]  }
   0xf   :  { %400 = vmatpush1.bf16.msra.mxu0 %v1077_v7  ;;  %981 = vmatpush3.bf16.msra.mxu1 %v1153_v29  ;;  %v1111_v43 = vld [vmem:[%s1545_s1 + $0xf4] ss:$8 sps:$4 sm:$0xff]   ;;  %v1161_v44 = vld [vmem:[%s1547_s3 + $0x28] sm:$0xff]   ;;  %v1113_v45 = vld [vmem:[%s1545_s1 + $0xf0] ss:$8 sps:$4 sm:$0xff]  }
  0x10   :  { %401 = vmatprep.subr.bf16.mxu0 %v1078_v8  ;;  %982 = vmatprep.subr.bf16.mxu1 %v1154_v30  ;;  %v33_v46 = vld [vmem:[%s1546_s0] sm:$0xff]  ;;  %v36_v48 = vld [vmem:[%s1546_s0 + $0x18] sm:$0xff]  ;;  %v1163_v13 = vld [vmem:[%s1547_s3 + $0x30] sm:$0xff]  }
  0x11   :  { %v1116_v47 = vld [vmem:[%s1545_s1 + $0x104] ss:$8 sps:$4 sm:$0xff]   ;;  %v37_v49 = vpack.c.bf16 %v33_v46, %v33_v46  ;;  %v1114_v50 = vld [vmem:[%s1545_s1 + $0x100] ss:$8 sps:$4 sm:$0xff]   ;;  %v40_v51 = vpack.c.bf16 %v36_v48, %v36_v48  ;;  %v1119_v52 = vld [vmem:[%s1545_s1 + $0x114] ss:$8 sps:$4 sm:$0xff]  }
  0x12   :  { %v1117_v53 = vld [vmem:[%s1545_s1 + $0x110] ss:$8 sps:$4 sm:$0xff]   ;;  %v1122_v54 = vld [vmem:[%s1545_s1 + $0x124] ss:$8 sps:$4 sm:$0xff]   ;;  %v1120_v55 = vld [vmem:[%s1545_s1 + $0x120] ss:$8 sps:$4 sm:$0xff]  }
  0x13   :  { %402 = vmatpush1.bf16.msra.mxu0 %v1080_v9  ;;  %983 = vmatpush3.bf16.msra.mxu1 %v1155_v33  ;;  %v1125_v56 = vld [vmem:[%s1545_s1 + $0x134] ss:$8 sps:$4 sm:$0xff]   ;;  %v1123_v57 = vld [vmem:[%s1545_s1 + $0x130] ss:$8 sps:$4 sm:$0xff]   ;;  %v1128_v58 = vld [vmem:[%s1545_s1 + $0x144] ss:$8 sps:$4 sm:$0xff]  }
  0x14   :  { %403 = vmatprep.subr.bf16.mxu0 %v1081_v10  ;;  %984 = vmatprep.subr.bf16.mxu1 %v1156_v34  ;;  %v1126_v59 = vld [vmem:[%s1545_s1 + $0x140] ss:$8 sps:$4 sm:$0xff]   ;;  %v1131_v60 = vld [vmem:[%s1545_s1 + $0x154] ss:$8 sps:$4 sm:$0xff]   ;;  %v1129_v61 = vld [vmem:[%s1545_s1 + $0x150] ss:$8 sps:$4 sm:$0xff]  }
  0x15   :  { %v1134_v62 = vld [vmem:[%s1545_s1 + $0x164] ss:$8 sps:$4 sm:$0xff]   ;;  %v1132_v63 = vld [vmem:[%s1545_s1 + $0x160] ss:$8 sps:$4 sm:$0xff]   ;;  %v1137_v0 = vld [vmem:[%s1545_s1 + $0x174] ss:$8 sps:$4 sm:$0xff]  }
  0x16   :  { %v1135_v1 = vld [vmem:[%s1545_s1 + $0x170] ss:$8 sps:$4 sm:$0xff]   ;;  %v1140_v2 = vld [vmem:[%s1545_s1 + $0x184] ss:$8 sps:$4 sm:$0xff]   ;;  %v1138_v3 = vld [vmem:[%s1545_s1 + $0x180] ss:$8 sps:$4 sm:$0xff]  }
  0x17   :  { %404 = vmatpush1.bf16.msra.mxu0 %v1083_v11  ;;  %985 = vmatpush3.bf16.msra.mxu1 %v1157_v38  ;;  %v1143_v4 = vld [vmem:[%s1545_s1 + $0x194] ss:$8 sps:$4 sm:$0xff]   ;;  %v1141_v5 = vld [vmem:[%s1545_s1 + $0x190] ss:$8 sps:$4 sm:$0xff]   ;;  %v1146_v6 = vld [vmem:[%s1545_s1 + $0x1a4] ss:$8 sps:$4 sm:$0xff]  }
  0x18   :  { %405 = vmatprep.subr.bf16.mxu0 %v1084_v12  ;;  %986 = vmatprep.subr.bf16.mxu1 %v1158_v39  ;;  %v1144_v7 = vld [vmem:[%s1545_s1 + $0x1a0] ss:$8 sps:$4 sm:$0xff]   ;;  %v1149_v8 = vld [vmem:[%s1545_s1 + $0x1b4] ss:$8 sps:$4 sm:$0xff]   ;;  %v1147_v9 = vld [vmem:[%s1545_s1 + $0x1b0] ss:$8 sps:$4 sm:$0xff]  }
  0x19   :  { %v35_v10 = vld [vmem:[%s1546_s0 + $0x10] sm:$0xff]  ;;  %v1164_v14 = vld [vmem:[%s1547_s3 + $0x78] sm:$0xff]   ;;  %v1166_v33 = vld [vmem:[%s1548_s5] sm:$0xff]  }
  0x1a   :  { %v39_v11 = vpack.c.bf16 %v35_v10, %v35_v10  ;;  %v1162_v12 = vld [vmem:[%s1547_s3 + $0x70] sm:$0xff]   ;;  %v1170_v38 = vld [vmem:[%s1548_s5 + $0x20] sm:$0xff]   ;;  %v1171_v39 = vld [vmem:[%s1548_s5 + $0x28] sm:$0xff]  }
  0x1b   :  { %406 = vmatpush1.bf16.msra.mxu0 %v1086_v15  ;;  %987 = vmatpush3.bf16.msra.mxu1 %v1159_v40  ;;  %v1165_v15 = vld [vmem:[%s1547_s3 + $0x38] sm:$0xff]   ;;  %v1172_v40 = vld [vmem:[%s1548_s5 + $0x30] sm:$0xff]  }
  0x1c   :  { %407 = vmatprep.subr.bf16.mxu0 %v1087_v16  ;;  %988 = vmatprep.subr.bf16.mxu1 %v1160_v42  ;;  %v1182_v16 = vmov 0.0  }
  0x1f   :  { %408 = vmatpush1.bf16.msra.mxu0 %v1089_v17  ;;  %989 = vmatpush3.bf16.msra.mxu1 %v1161_v44  ;;  %v99_v17 = vlaneseq }
  0x20   :  { %409 = vmatprep.subr.bf16.mxu0 %v1090_v18  ;;  %990 = vmatprep.subr.bf16.mxu1 %v1162_v12 }
  0x21   :  { %v100_v18 = vshrl.u32 %v99_v17, 7 }
  0x23   :  { %410 = vmatpush1.bf16.msra.mxu0 %v1092_v19  ;;  %991 = vmatpush3.bf16.msra.mxu1 %v1163_v13  ;;  %v101_v19 = vsub.s32 0, %v100_v18 }
  0x24   :  { %411 = vmatprep.subr.bf16.mxu0 %v1093_v20  ;;  %992 = vmatprep.subr.bf16.mxu1 %v1164_v14  ;;  %v97_v20 = vld [vmem:[%s1549_s2] sm:$0x3] }
  0x27   :  { %412 = vmatpush1.bf16.msra.mxu0 %v1095_v21  ;;  %993 = vmatpush3.bf16.msra.mxu1 %v1165_v15  ;;  %v105_v21 = vsub.s32 1, %v100_v18 }
  0x28   :  { %413 = vmatprep.subr.bf16.mxu0 %v1096_v22  ;;  %1018 = vmatprep.subr.bf16.mxu1 %v1182_v16  ;;  %v102_v22 = vrot.slane %v97_v20, %v101_v19 }
  0x2b   :  { %414 = vmatpush1.bf16.msra.mxu0 %v1098_v23  ;;  %v106_v23 = vrot.slane %v97_v20, %v105_v21 }
  0x2c   :  { %415 = vmatprep.subr.bf16.mxu0 %v1099_v24 }
  0x2f   :  { %416 = vmatpush1.bf16.msra.mxu0 %v1101_v27 }
  0x30   :  { %417 = vmatprep.subr.bf16.mxu0 %v1102_v31 }
  0x33   :  { %418 = vmatpush1.bf16.msra.mxu0 %v1104_v32 }
  0x34   :  { %419 = vmatprep.subr.bf16.mxu0 %v1105_v35  ;;  %v1167_v35 = vld [vmem:[%s1548_s5 + $0x8] sm:$0xff]  }
  0x37   :  { %420 = vmatpush1.bf16.msra.mxu0 %v1107_v36  ;;  %v1168_v36 = vld [vmem:[%s1548_s5 + $0x10] sm:$0xff]  }
  0x38   :  { %421 = vmatprep.subr.bf16.mxu0 %v1108_v37  ;;  %v1169_v37 = vld [vmem:[%s1548_s5 + $0x18] sm:$0xff]  }
  0x3b   :  { %422 = vmatpush1.bf16.msra.mxu0 %v1110_v41  ;;  %v1173_v41 = vld [vmem:[%s1548_s5 + $0x38] sm:$0xff]  }
  0x3c   :  { %423 = vmatprep.subr.bf16.mxu0 %v1111_v43  ;;  %v943_v43 = vld [vmem:[%s1551_s4] ss:$0 sm:$0xff] }
  0x3f   :  { %424 = vmatpush1.bf16.msra.mxu0 %v1113_v45 }
  0x40   :  { %434 = vmatprep.subr.bf16.mxu0 %v1116_v47 }
  0x42   :  { %426 = vmatmul.mubr.bf16.vlgmr.msra.gmra.mrb[0].mxu0 %v37_v49 }
  0x43   :  { %435 = vmatpush1.bf16.msra.mxu0 %v1114_v50  ;;  %942 = vmatprep.mubr.msk.bf16.mxu0 %vm389_vm0, %v40_v51  ;;  %v1174_v50 = vld [vmem:[%s1550_s7] sm:$0xff]  }
  0x44   :  { %436 = vmatprep.subr.bf16.mxu0 %v1119_v52  ;;  %v1175_v52 = vld [vmem:[%s1550_s7 + $0x8] sm:$0xff]  }
  0x47   :  { %437 = vmatpush1.bf16.msra.mxu0 %v1117_v53  ;;  %v1176_v53 = vld [vmem:[%s1550_s7 + $0x10] sm:$0xff]  }
  0x48   :  { %438 = vmatprep.subr.bf16.mxu0 %v1122_v54  ;;  %v1177_v54 = vld [vmem:[%s1550_s7 + $0x18] sm:$0xff]  }
  0x4b   :  { %439 = vmatpush1.bf16.msra.mxu0 %v1120_v55  ;;  %v1178_v55 = vld [vmem:[%s1550_s7 + $0x20] sm:$0xff]  }
  0x4c   :  { %440 = vmatprep.subr.bf16.mxu0 %v1125_v56  ;;  %v1179_v56 = vld [vmem:[%s1550_s7 + $0x28] sm:$0xff]  }
  0x4f   :  { %441 = vmatpush1.bf16.msra.mxu0 %v1123_v57  ;;  %v1180_v57 = vld [vmem:[%s1550_s7 + $0x30] sm:$0xff]  }
  0x50   :  { %442 = vmatprep.subr.bf16.mxu0 %v1128_v58  ;;  %v1181_v58 = vld [vmem:[%s1550_s7 + $0x38] sm:$0xff]  }
  0x53   :  { %443 = vmatpush1.bf16.msra.mxu0 %v1126_v59  ;;  %v960_v59 = vld [vmem:[%s1552_s6] ss:$0 sm:$0xff] }
  0x54   :  { %444 = vmatprep.subr.bf16.mxu0 %v1131_v60 }
  0x57   :  { %445 = vmatpush1.bf16.msra.mxu0 %v1129_v61 }
  0x58   :  { %446 = vmatprep.subr.bf16.mxu0 %v1134_v62 }
  0x5b   :  { %447 = vmatpush1.bf16.msra.mxu0 %v1132_v63 }
  0x5c   :  { %448 = vmatprep.subr.bf16.mxu0 %v1137_v0 }
  0x5f   :  { %449 = vmatpush1.bf16.msra.mxu0 %v1135_v1 }
  0x60   :  { %450 = vmatprep.subr.bf16.mxu0 %v1140_v2 }
  0x63   :  { %451 = vmatpush1.bf16.msra.mxu0 %v1138_v3  ;;  %v969_v3 = vld [vmem:[%s1553_s8] ss:$0 sm:$0xff] }
  0x64   :  { %452 = vmatprep.subr.bf16.mxu0 %v1143_v4 }
  0x67   :  { %453 = vmatpush1.bf16.msra.mxu0 %v1141_v5 }
  0x68   :  { %454 = vmatprep.subr.bf16.mxu0 %v1146_v6 }
  0x6b   :  { %455 = vmatpush1.bf16.msra.mxu0 %v1144_v7 }
  0x6c   :  { %456 = vmatprep.subr.bf16.mxu0 %v1149_v8 }
  0x6f   :  { %457 = vmatpush1.bf16.msra.mxu0 %v1147_v9 }
  0x72   :  { %467 = vmatmul.mubr.bf16.vlgmr.msra.gmra.mrb[0].mxu0 %v39_v11 }
 0x145   :  { %v468_v24 = vpop.f32.mrb[0].mxu0 }
 0x146   :  { %v1058_v25 = vadd.f32 %v468_v24, %v102_v22  ;;  %v470_v26 = vpop.f32.mrb[1].mxu0 }
 0x147   :  { %v1059_v27 = vadd.f32 %v470_v26, %v106_v23  ;;  %v472_v28 = vpop.f32.mrb[2].mxu0 }
 0x148   :  { %v475_v29 = vmax.f32 %v1058_v25, 0.0  ;;  %v473_v30 = vpop.f32.mrb[3].mxu0 }
 0x149   :  { %v476_v31 = vmax.f32 %v1059_v27, 0.0 }
 0x14a   :  { %v477_v34 = vpack.c.bf16 %v475_v29, %v475_v29 }
 0x14b   :  { %v478_v32 = vpack.c.bf16 %v476_v31, %v476_v31 }
 0x14d   :  { %646 = vmatprep.mubr.bf16.mxu1 %v478_v32 }
 0x14e   :  { %647 = vmatmul.mubr.bf16.vlgmr.msra.gmra.mrb[0].mxu1 %v477_v34 }
 0x14f   :  { %1019 = vmatpush3.bf16.msra.mxu1 %v1166_v33  ;;  %1034 = vmatprep.mubr.msk.bf16.mxu1 %vm1183_vm1, %v1182_v16 }
 0x150   :  { %1020 = vmatprep.subr.bf16.mxu1 %v1182_v16 }
 0x153   :  { %1021 = vmatpush3.bf16.msra.mxu1 %v1167_v35 }
 0x154   :  { %1022 = vmatprep.subr.bf16.mxu1 %v1182_v16 }
 0x157   :  { %1023 = vmatpush3.bf16.msra.mxu1 %v1168_v36 }
 0x158   :  { %1024 = vmatprep.subr.bf16.mxu1 %v1182_v16 }
 0x15b   :  { %1025 = vmatpush3.bf16.msra.mxu1 %v1169_v37 }
 0x15c   :  { %1026 = vmatprep.subr.bf16.mxu1 %v1182_v16 }
 0x15f   :  { %1027 = vmatpush3.bf16.msra.mxu1 %v1170_v38 }
 0x160   :  { %1028 = vmatprep.subr.bf16.mxu1 %v1182_v16 }
 0x163   :  { %1029 = vmatpush3.bf16.msra.mxu1 %v1171_v39 }
 0x164   :  { %1030 = vmatprep.subr.bf16.mxu1 %v1182_v16 }
 0x167   :  { %1031 = vmatpush3.bf16.msra.mxu1 %v1172_v40 }
 0x168   :  { %1032 = vmatprep.subr.bf16.mxu1 %v1182_v16 }
 0x16b   :  { %1033 = vmatpush3.bf16.msra.mxu1 %v1173_v41 }
 0x16c   :  { %1038 = vmatprep.subr.bf16.mxu1 %v1182_v16 }
 0x221   :  { %v994_v42 = vpop.f32.mrb[0].mxu1 }
 0x222   :  { %v995_v44 = vpop.f32.mrb[1].mxu1 }
 0x223   :  { %v996_v45 = vadd.f32 %v995_v44, %v994_v42  ;;  %v997_v46 = vpop.f32.mrb[2].mxu1 }
 0x224   :  { %v998_v47 = vpop.f32.mrb[3].mxu1 }
 0x225   :  { %v649_v48 = vadd.f32 %v996_v45, %v943_v43 }
 0x227   :  { %v654_v49 = vmax.f32 %v649_v48, 0.0 }
 0x229   :  { %v655_v51 = vpack.c.bf16 %v654_v49, %v654_v49 }
 0x22b   :  { %1035 = vmatmul.mubr.bf16.vlgmr.msra.gmra.mrb[4].mxu1 %v655_v51 }
 0x22c   :  { %1039 = vmatpush3.bf16.msra.mxu1 %v1174_v50  ;;  %1054 = vmatprep.mubr.msk.bf16.mxu1 %vm1183_vm1, %v1182_v16 }
 0x22d   :  { %1040 = vmatprep.subr.bf16.mxu1 %v1182_v16 }
 0x230   :  { %1041 = vmatpush3.bf16.msra.mxu1 %v1175_v52 }
 0x231   :  { %1042 = vmatprep.subr.bf16.mxu1 %v1182_v16 }
 0x234   :  { %1043 = vmatpush3.bf16.msra.mxu1 %v1176_v53 }
 0x235   :  { %1044 = vmatprep.subr.bf16.mxu1 %v1182_v16 }
 0x238   :  { %1045 = vmatpush3.bf16.msra.mxu1 %v1177_v54 }
 0x239   :  { %1046 = vmatprep.subr.bf16.mxu1 %v1182_v16 }
 0x23c   :  { %1047 = vmatpush3.bf16.msra.mxu1 %v1178_v55 }
 0x23d   :  { %1048 = vmatprep.subr.bf16.mxu1 %v1182_v16 }
 0x240   :  { %1049 = vmatpush3.bf16.msra.mxu1 %v1179_v56 }
 0x241   :  { %1050 = vmatprep.subr.bf16.mxu1 %v1182_v16 }
 0x244   :  { %1051 = vmatpush3.bf16.msra.mxu1 %v1180_v57 }
 0x245   :  { %1052 = vmatprep.subr.bf16.mxu1 %v1182_v16 }
 0x248   :  { %1053 = vmatpush3.bf16.msra.mxu1 %v1181_v58 }
 0x2fe   :  { %v761_v60 = vpop.f32.mrb[4].mxu1 }
 0x2ff   :  { %v762_v61 = vadd.f32 %v960_v59, %v761_v60  ;;  %v1036_v62 = vpop.f32.mrb[5].mxu1 }
 0x300   :  { %v764_v63 = vpop.f32.mrb[6].mxu1 }
 0x301   :  { %v767_v0 = vmax.f32 %v762_v61, 0.0  ;;  %v1037_v1 = vpop.f32.mrb[7].mxu1 }
 0x303   :  { %v768_v2 = vpack.c.bf16 %v767_v0, %v767_v0 }
 0x305   :  { %1055 = vmatmul.mubr.bf16.vlgmr.msra.gmra.mrb[8].mxu1 %v768_v2 }
 0x3d8   :  { %v874_v4 = vpop.f32.mrb[8].mxu1 }
 0x3d9   :  { %v875_v5 = vadd.f32 %v969_v3, %v874_v4  ;;  %v1056_v6 = vpop.f32.mrb[9].mxu1 }
 0x3da   :  { %v877_v7 = vpop.f32.mrb[10].mxu1 }
 0x3db   :  { %v880_v8 = vpack.c.bf16 %v875_v5, %v875_v5  ;;  %v1057_v9 = vpop.f32.mrb[11].mxu1 }
 0x3dd   :  { %881 = vst [vmem:[%s1554_s9] sm:$0xf] %v880_v8 }

</bundles_post_ra>
